<compile_context>
chip_gen: v7x
topology: tpu7x:2x2x1
jax: 0.10.0
libtpu: 0.0.40
codegen_flags: <defaults>
</compile_context>

<pallas_src>
import functools

import jax
import jax.numpy as jnp
from jax.experimental import pallas as pl
from jax.experimental.pallas import tpu as pltpu


def _round_up(x, m):
    return ((x + m - 1) // m) * m


def _adv_loss_kernel(gen_ref, real_ref, w_ref, b_ref, out_ref, acc_ref, *,
                     n_valid, n_patch, tm, smoothing):
    i = pl.program_id(0)

    @pl.when(i == 0)
    def _():
        acc_ref[0] = 0.0
        acc_ref[1] = 0.0
        acc_ref[2] = 0.0
        acc_ref[3] = 0.0

    # One stacked bf16 matmul per step: rows [0:tm) are gen, [tm:2tm) are real.
    x = jnp.concatenate([gen_ref[...], real_ref[...]], axis=0)          # (2tm, F)
    logits = (
        jnp.dot(x, w_ref[...], preferred_element_type=jnp.float32)
        + b_ref[...]
    )                                                                   # (2tm, P) f32

    # Stable BCE via the core term: bce(x, y) = core(x) - y * x,
    #   core(x) = max(x, 0) + log1p(exp(-|x|))
    core = jnp.maximum(logits, 0.0) + jnp.log1p(jnp.exp(-jnp.abs(logits)))

    # Lane-axis reduce once -> per-row partials, then mask padded batch rows.
    row_core = jnp.sum(core, axis=-1, keepdims=True)                    # (2tm, 1)
    row_lin = jnp.sum(logits, axis=-1, keepdims=True)                   # (2tm, 1)

    row_ids = jax.lax.broadcasted_iota(jnp.int32, (tm, 1), 0) + i * tm
    valid = (row_ids < n_valid).astype(jnp.float32)                     # (tm, 1)

    acc_ref[0] += jnp.sum(row_core[:tm] * valid)   # sum core(gen_logits)
    acc_ref[1] += jnp.sum(row_lin[:tm] * valid)    # sum gen_logits
    acc_ref[2] += jnp.sum(row_core[tm:] * valid)   # sum core(real_logits)
    acc_ref[3] += jnp.sum(row_lin[tm:] * valid)    # sum real_logits

    @pl.when(i == pl.num_programs(0) - 1)
    def _():
        inv_n = 1.0 / float(n_valid * n_patch)
        # generator: targets = 1 everywhere.
        gen_loss = (acc_ref[0] - acc_ref[1]) * inv_n
        # discriminator: real targets = 1 - smoothing, gen targets = 0,
        # mean over the concatenation (2n elements).
        disc_loss = (
            acc_ref[2] - (1.0 - smoothing) * acc_ref[3] + acc_ref[0]
        ) * (0.5 * inv_n)
        out_ref[0] = gen_loss
        out_ref[1] = disc_loss
        out_ref[2] = 0.5 * (gen_loss + disc_loss)


def adversarial_loss(gen_samples, real_samples, w, b, smoothing=0.0,
                     block_rows=256):
    """Fused discriminator + adversarial-loss Pallas kernel.

    gen_samples, real_samples: (N, C, H, W) float32 (NCHW, like PyTorch).
    w: (C*H*W, P) float32 discriminator weight; b: (1, P) float32 bias.
    Returns dict of scalar losses.
    """
    n = gen_samples.shape[0]
    feat, p = w.shape
    assert real_samples.shape[0] == n

    # Row tile: multiple of 16 (bf16 sublane packing); 256-aligned for large N.
    tm = min(_round_up(block_rows, 16), _round_up(n, 16))
    n_pad = _round_up(n, tm)
    pad = n_pad - n

    gen_flat = gen_samples.reshape(n, feat)
    real_flat = real_samples.reshape(n, feat)
    if pad:
        gen_flat = jnp.pad(gen_flat, ((0, pad), (0, 0)))
        real_flat = jnp.pad(real_flat, ((0, pad), (0, 0)))
    # bf16 matmul inputs (halves HBM traffic, native MXU rate); f32 accumulate.
    gen_flat = gen_flat.astype(jnp.bfloat16)
    real_flat = real_flat.astype(jnp.bfloat16)
    w_bf16 = w.astype(jnp.bfloat16)
    b_f32 = b.reshape(1, p).astype(jnp.float32)

    grid = (n_pad // tm,)
    kernel = functools.partial(
        _adv_loss_kernel,
        n_valid=n, n_patch=p, tm=tm, smoothing=float(smoothing),
    )

    cost = pl.CostEstimate(
        flops=2 * (2 * n_pad) * feat * p,
        transcendentals=2 * (2 * n_pad) * p,
        bytes_accessed=(2 * n_pad * feat + feat * p) * 2 + p * 4 + 3 * 4,
    )

    out = pl.pallas_call(
        kernel,
        out_shape=jax.ShapeDtypeStruct((3,), jnp.float32),
        grid_spec=pltpu.PrefetchScalarGridSpec(
            num_scalar_prefetch=0,
            grid=grid,
            in_specs=[
                pl.BlockSpec((tm, feat), lambda i: (i, 0)),   # gen row tile
                pl.BlockSpec((tm, feat), lambda i: (i, 0)),   # real row tile
                pl.BlockSpec((feat, p), lambda i: (0, 0)),    # W (resident)
                pl.BlockSpec((1, p), lambda i: (0, 0)),       # bias (resident)
            ],
            out_specs=pl.BlockSpec((3,), lambda i: (0,),
                                   memory_space=pltpu.MemorySpace.SMEM),
            scratch_shapes=[pltpu.SMEM((4,), jnp.float32)],
        ),
        compiler_params=pltpu.CompilerParams(
            dimension_semantics=("arbitrary",)),
        cost_estimate=cost,
    )(gen_flat, real_flat, w_bf16, b_f32)

    return {
        "generator_adversarial": out[0],
        "discriminator_adversarial": out[1],
        "adversarial": out[2],  # (generator + discriminator) / 2, i.e. forward()
    }


def _reference(gen_samples, real_samples, w, b, smoothing):
    """Pure-JAX reference mirroring the PyTorch math (bf16 matmul, f32 acc)."""
    n = gen_samples.shape[0]
    gen_flat = gen_samples.reshape(n, -1).astype(jnp.bfloat16)
    real_flat = real_samples.reshape(n, -1).astype(jnp.bfloat16)
    w_bf16 = w.astype(jnp.bfloat16)
    gen_logits = jnp.dot(gen_flat, w_bf16,
                         preferred_element_type=jnp.float32) + b
    real_logits = jnp.dot(real_flat, w_bf16,
                          preferred_element_type=jnp.float32) + b

    def bce(x, y):
        return jnp.maximum(x, 0.0) - x * y + jnp.log1p(jnp.exp(-jnp.abs(x)))

    gen_loss = jnp.mean(bce(gen_logits, 1.0))
    logits_cat = jnp.concatenate([real_logits, gen_logits], axis=0)
    targets_cat = jnp.concatenate(
        [jnp.full_like(real_logits, 1.0 - smoothing),
         jnp.zeros_like(gen_logits)],
        axis=0,
    )
    disc_loss = jnp.mean(bce(logits_cat, targets_cat))
    return gen_loss, disc_loss, 0.5 * (gen_loss + disc_loss)


if __name__ == "__main__":
    key = jax.random.PRNGKey(0)
    k_gen, k_real, k_w = jax.random.split(key, 3)

    N, C, H, W = 2, 4, 16, 16  # small NCHW samples, like PyTorch conv inputs
    P = 128                    # synthetic discriminator patch-logit count
    FEAT = C * H * W

    gen_samples = jax.random.normal(k_gen, (N, C, H, W), dtype=jnp.float32)
    real_samples = jax.random.normal(k_real, (N, C, H, W), dtype=jnp.float32)

    # Deterministic synthetic discriminator parameters (stand-in for the
    # external torch.nn.Module discriminator).
    w = 0.02 * jax.random.normal(k_w, (FEAT, P), dtype=jnp.float32)
    b = jnp.zeros((1, P), dtype=jnp.float32)

    smoothing = 0.1

    losses = adversarial_loss(gen_samples, real_samples, w, b,
                              smoothing=smoothing)
    losses = jax.block_until_ready(losses)

    ref_gen, ref_disc, ref_total = _reference(
        gen_samples, real_samples, w, b, smoothing
    )

    # bf16 matmul inputs -> slightly looser tolerance than the pure-f32 path.
    assert jnp.allclose(losses["generator_adversarial"], ref_gen,
                        rtol=1e-3, atol=1e-4)
    assert jnp.allclose(losses["discriminator_adversarial"], ref_disc,
                        rtol=1e-3, atol=1e-4)
    assert jnp.allclose(losses["adversarial"], ref_total,
                        rtol=1e-3, atol=1e-4)

    print("KERNEL_OK")
</pallas_src>

<mosaic_0001>
module attributes {stable_mosaic.version = 11 : i64} {
  func.func @_adv_loss_kernel(%arg0: i32, %arg1: memref<16x1024xbf16, #tpu.memory_space<vmem>>, %arg2: memref<16x1024xbf16, #tpu.memory_space<vmem>>, %arg3: memref<1024x128xbf16, #tpu.memory_space<vmem>>, %arg4: memref<1x128xf32, #tpu.memory_space<vmem>>, %arg5: memref<3xf32, #tpu.memory_space<smem>>, %arg6: memref<4xf32, #tpu.memory_space<smem>>) attributes {dimension_semantics = [#tpu.dimension_semantics<arbitrary>], iteration_bounds = array<i64: 1>, scalar_prefetch = 0 : i64, scratch_operands = 1 : i64, tpu.core_type = #tpu.core_type<tc>, window_params = [{transform_indices = @transform_0, window_bounds = array<i64: 16, 1024>}, {transform_indices = @transform_1, window_bounds = array<i64: 16, 1024>}, {pipeline_mode = #tpu.pipeline_mode<synchronous>, transform_indices = @transform_2, window_bounds = array<i64: 1024, 128>}, {pipeline_mode = #tpu.pipeline_mode<synchronous>, transform_indices = @transform_3, window_bounds = array<i64: 1, 128>}, {transform_indices = @transform_4, window_bounds = array<i64: 3>}]} {
    %c0_i32 = arith.constant 0 : i32
    %0 = arith.cmpi eq, %arg0, %c0_i32 : i32
    %1 = arith.extui %0 : i1 to i32
    %c0_i32_0 = arith.constant 0 : i32
    %2 = arith.cmpi ne, %1, %c0_i32_0 : i32
    scf.if %2 {
      %cst_23 = arith.constant 0.000000e+00 : f32
      %c0_24 = arith.constant 0 : index
      %70 = memref.load %arg6[%c0_24] : memref<4xf32, #tpu.memory_space<smem>>
      memref.store %cst_23, %arg6[%c0_24] : memref<4xf32, #tpu.memory_space<smem>>
      %cst_25 = arith.constant 0.000000e+00 : f32
      %c1_26 = arith.constant 1 : index
      %71 = memref.load %arg6[%c1_26] : memref<4xf32, #tpu.memory_space<smem>>
      memref.store %cst_25, %arg6[%c1_26] : memref<4xf32, #tpu.memory_space<smem>>
      %cst_27 = arith.constant 0.000000e+00 : f32
      %c2_28 = arith.constant 2 : index
      %72 = memref.load %arg6[%c2_28] : memref<4xf32, #tpu.memory_space<smem>>
      memref.store %cst_27, %arg6[%c2_28] : memref<4xf32, #tpu.memory_space<smem>>
      %cst_29 = arith.constant 0.000000e+00 : f32
      %c3_30 = arith.constant 3 : index
      %73 = memref.load %arg6[%c3_30] : memref<4xf32, #tpu.memory_space<smem>>
      memref.store %cst_29, %arg6[%c3_30] : memref<4xf32, #tpu.memory_space<smem>>
    } else {
    }
    %c0 = arith.constant 0 : index
    %c0_1 = arith.constant 0 : index
    %3 = vector.load %arg1[%c0, %c0_1] : memref<16x1024xbf16, #tpu.memory_space<vmem>>, vector<16x1024xbf16>
    %c0_2 = arith.constant 0 : index
    %c0_3 = arith.constant 0 : index
    %4 = vector.load %arg2[%c0_2, %c0_3] : memref<16x1024xbf16, #tpu.memory_space<vmem>>, vector<16x1024xbf16>
    %5 = tpu.concatenate %3, %4 in 0 : vector<16x1024xbf16>, vector<16x1024xbf16> -> vector<32x1024xbf16>
    %c0_4 = arith.constant 0 : index
    %c0_5 = arith.constant 0 : index
    %6 = vector.load %arg3[%c0_4, %c0_5] : memref<1024x128xbf16, #tpu.memory_space<vmem>>, vector<1024x128xbf16>
    %cst = arith.constant dense<0.000000e+00> : vector<32x128xf32>
    %7 = tpu.matmul %5, %6, %cst {dimension_numbers = #tpu.dot_dimension_numbers<[1], [0], [0], [1], [0, 0, 1, 1], [], []>} : vector<32x1024xbf16>, vector<1024x128xbf16>, vector<32x128xf32> -> vector<32x128xf32>
    %c0_6 = arith.constant 0 : index
    %c0_7 = arith.constant 0 : index
    %8 = vector.load %arg4[%c0_6, %c0_7] : memref<1x128xf32, #tpu.memory_space<vmem>>, vector<1x128xf32>
    %9 = vector.broadcast %8 : vector<1x128xf32> to vector<32x128xf32>
    %10 = arith.addf %7, %9 : vector<32x128xf32>
    %cst_8 = arith.constant 0.000000e+00 : f32
    %11 = vector.broadcast %cst_8 : f32 to vector<32x128xf32>
    %12 = arith.maximumf %10, %11 : vector<32x128xf32>
    %13 = math.absf %10 : vector<32x128xf32>
    %cst_9 = arith.constant 0.000000e+00 : f32
    %14 = vector.broadcast %cst_9 : f32 to vector<32x128xf32>
    %15 = arith.subf %14, %13 : vector<32x128xf32>
    %16 = math.exp %15 : vector<32x128xf32>
    %17 = math.log1p %16 : vector<32x128xf32>
    %18 = arith.addf %12, %17 : vector<32x128xf32>
    %cst_10 = arith.constant dense<0.000000e+00> : vector<32xf32>
    %19 = vector.multi_reduction <add>, %18, %cst_10 [1] : vector<32x128xf32> to vector<32xf32>
    %20 = vector.shape_cast %19 : vector<32xf32> to vector<32x1xf32>
    %cst_11 = arith.constant dense<0.000000e+00> : vector<32xf32>
    %21 = vector.multi_reduction <add>, %10, %cst_11 [1] : vector<32x128xf32> to vector<32xf32>
    %22 = vector.shape_cast %21 : vector<32xf32> to vector<32x1xf32>
    %23 = tpu.iota {dimensions = array<i32: 0>} : vector<16x1xi32>
    %c16_i32 = arith.constant 16 : i32
    %24 = arith.muli %arg0, %c16_i32 : i32
    %25 = vector.broadcast %24 : i32 to vector<16x1xi32>
    %26 = arith.addi %23, %25 : vector<16x1xi32>
    %c2_i32 = arith.constant 2 : i32
    %27 = vector.broadcast %c2_i32 : i32 to vector<16x1xi32>
    %28 = arith.cmpi slt, %26, %27 : vector<16x1xi32>
    %29 = arith.extui %28 : vector<16x1xi1> to vector<16x1xi32>
    %30 = arith.sitofp %29 : vector<16x1xi32> to vector<16x1xf32>
    %c0_12 = arith.constant 0 : index
    %31 = memref.load %arg6[%c0_12] : memref<4xf32, #tpu.memory_space<smem>>
    %32 = vector.extract_strided_slice %20 {offsets = [0, 0], sizes = [16, 1], strides = [1, 1]} : vector<32x1xf32> to vector<16x1xf32>
    %33 = arith.mulf %32, %30 : vector<16x1xf32>
    %34 = vector.shape_cast %33 : vector<16x1xf32> to vector<1x16x1xf32>
    %cst_13 = arith.constant dense<0.000000e+00> : vector<1xf32>
    %35 = vector.multi_reduction <add>, %34, %cst_13 [1, 2] : vector<1x16x1xf32> to vector<1xf32>
    %36 = vector.shape_cast %35 : vector<1xf32> to vector<1x1x1xf32>
    %37 = vector.extract %36[0, 0, 0] : f32 from vector<1x1x1xf32>
    %38 = arith.addf %31, %37 : f32
    %c0_14 = arith.constant 0 : index
    %39 = memref.load %arg6[%c0_14] : memref<4xf32, #tpu.memory_space<smem>>
    memref.store %38, %arg6[%c0_14] : memref<4xf32, #tpu.memory_space<smem>>
    %c1 = arith.constant 1 : index
    %40 = memref.load %arg6[%c1] : memref<4xf32, #tpu.memory_space<smem>>
    %41 = vector.extract_strided_slice %22 {offsets = [0, 0], sizes = [16, 1], strides = [1, 1]} : vector<32x1xf32> to vector<16x1xf32>
    %42 = arith.mulf %41, %30 : vector<16x1xf32>
    %43 = vector.shape_cast %42 : vector<16x1xf32> to vector<1x16x1xf32>
    %cst_15 = arith.constant dense<0.000000e+00> : vector<1xf32>
    %44 = vector.multi_reduction <add>, %43, %cst_15 [1, 2] : vector<1x16x1xf32> to vector<1xf32>
    %45 = vector.shape_cast %44 : vector<1xf32> to vector<1x1x1xf32>
    %46 = vector.extract %45[0, 0, 0] : f32 from vector<1x1x1xf32>
    %47 = arith.addf %40, %46 : f32
    %c1_16 = arith.constant 1 : index
    %48 = memref.load %arg6[%c1_16] : memref<4xf32, #tpu.memory_space<smem>>
    memref.store %47, %arg6[%c1_16] : memref<4xf32, #tpu.memory_space<smem>>
    %c2 = arith.constant 2 : index
    %49 = memref.load %arg6[%c2] : memref<4xf32, #tpu.memory_space<smem>>
    %50 = vector.extract_strided_slice %20 {offsets = [16, 0], sizes = [16, 1], strides = [1, 1]} : vector<32x1xf32> to vector<16x1xf32>
    %51 = arith.mulf %50, %30 : vector<16x1xf32>
    %52 = vector.shape_cast %51 : vector<16x1xf32> to vector<1x16x1xf32>
    %cst_17 = arith.constant dense<0.000000e+00> : vector<1xf32>
    %53 = vector.multi_reduction <add>, %52, %cst_17 [1, 2] : vector<1x16x1xf32> to vector<1xf32>
    %54 = vector.shape_cast %53 : vector<1xf32> to vector<1x1x1xf32>
    %55 = vector.extract %54[0, 0, 0] : f32 from vector<1x1x1xf32>
    %56 = arith.addf %49, %55 : f32
    %c2_18 = arith.constant 2 : index
    %57 = memref.load %arg6[%c2_18] : memref<4xf32, #tpu.memory_space<smem>>
    memref.store %56, %arg6[%c2_18] : memref<4xf32, #tpu.memory_space<smem>>
    %c3 = arith.constant 3 : index
    %58 = memref.load %arg6[%c3] : memref<4xf32, #tpu.memory_space<smem>>
    %59 = vector.extract_strided_slice %22 {offsets = [16, 0], sizes = [16, 1], strides = [1, 1]} : vector<32x1xf32> to vector<16x1xf32>
    %60 = arith.mulf %59, %30 : vector<16x1xf32>
    %61 = vector.shape_cast %60 : vector<16x1xf32> to vector<1x16x1xf32>
    %cst_19 = arith.constant dense<0.000000e+00> : vector<1xf32>
    %62 = vector.multi_reduction <add>, %61, %cst_19 [1, 2] : vector<1x16x1xf32> to vector<1xf32>
    %63 = vector.shape_cast %62 : vector<1xf32> to vector<1x1x1xf32>
    %64 = vector.extract %63[0, 0, 0] : f32 from vector<1x1x1xf32>
    %65 = arith.addf %58, %64 : f32
    %c3_20 = arith.constant 3 : index
    %66 = memref.load %arg6[%c3_20] : memref<4xf32, #tpu.memory_space<smem>>
    memref.store %65, %arg6[%c3_20] : memref<4xf32, #tpu.memory_space<smem>>
    %c0_i32_21 = arith.constant 0 : i32
    %67 = arith.cmpi eq, %arg0, %c0_i32_21 : i32
    %68 = arith.extui %67 : i1 to i32
    %c0_i32_22 = arith.constant 0 : i32
    %69 = arith.cmpi ne, %68, %c0_i32_22 : i32
    scf.if %69 {
      %c0_23 = arith.constant 0 : index
      %70 = memref.load %arg6[%c0_23] : memref<4xf32, #tpu.memory_space<smem>>
      %c1_24 = arith.constant 1 : index
      %71 = memref.load %arg6[%c1_24] : memref<4xf32, #tpu.memory_space<smem>>
      %72 = arith.subf %70, %71 : f32
      %cst_25 = arith.constant 3.906250e-03 : f32
      %73 = arith.mulf %72, %cst_25 : f32
      %c2_26 = arith.constant 2 : index
      %74 = memref.load %arg6[%c2_26] : memref<4xf32, #tpu.memory_space<smem>>
      %c3_27 = arith.constant 3 : index
      %75 = memref.load %arg6[%c3_27] : memref<4xf32, #tpu.memory_space<smem>>
      %cst_28 = arith.constant 0.899999976 : f32
      %76 = arith.mulf %cst_28, %75 : f32
      %77 = arith.subf %74, %76 : f32
      %c0_29 = arith.constant 0 : index
      %78 = memref.load %arg6[%c0_29] : memref<4xf32, #tpu.memory_space<smem>>
      %79 = arith.addf %77, %78 : f32
      %cst_30 = arith.constant 0.001953125 : f32
      %80 = arith.mulf %79, %cst_30 : f32
      %c0_31 = arith.constant 0 : index
      %81 = memref.load %arg5[%c0_31] : memref<3xf32, #tpu.memory_space<smem>>
      memref.store %73, %arg5[%c0_31] : memref<3xf32, #tpu.memory_space<smem>>
      %c1_32 = arith.constant 1 : index
      %82 = memref.load %arg5[%c1_32] : memref<3xf32, #tpu.memory_space<smem>>
      memref.store %80, %arg5[%c1_32] : memref<3xf32, #tpu.memory_space<smem>>
      %83 = arith.addf %73, %80 : f32
      %cst_33 = arith.constant 5.000000e-01 : f32
      %84 = arith.mulf %cst_33, %83 : f32
      %c2_34 = arith.constant 2 : index
      %85 = memref.load %arg5[%c2_34] : memref<3xf32, #tpu.memory_space<smem>>
      memref.store %84, %arg5[%c2_34] : memref<3xf32, #tpu.memory_space<smem>>
    } else {
    }
    return
  }
  func.func @transform_0(%arg0: i32) -> (i32, i32) {
    %c0_i32 = arith.constant 0 : i32
    %c0_i32_0 = arith.constant 0 : i32
    return %arg0, %c0_i32 : i32, i32
  }
  func.func @transform_1(%arg0: i32) -> (i32, i32) {
    %c0_i32 = arith.constant 0 : i32
    %c0_i32_0 = arith.constant 0 : i32
    return %arg0, %c0_i32 : i32, i32
  }
  func.func @transform_2(%arg0: i32) -> (i32, i32) {
    %c0_i32 = arith.constant 0 : i32
    %c0_i32_0 = arith.constant 0 : i32
    %c0_i32_1 = arith.constant 0 : i32
    return %c0_i32, %c0_i32_0 : i32, i32
  }
  func.func @transform_3(%arg0: i32) -> (i32, i32) {
    %c0_i32 = arith.constant 0 : i32
    %c0_i32_0 = arith.constant 0 : i32
    %c0_i32_1 = arith.constant 0 : i32
    return %c0_i32, %c0_i32_0 : i32, i32
  }
  func.func @transform_4(%arg0: i32) -> i32 {
    %c0_i32 = arith.constant 0 : i32
    %c0_i32_0 = arith.constant 0 : i32
    return %c0_i32 : i32
  }
}

</mosaic_0001>

<bundles_post_ra>
// kernel: tpu_custom_call.1
= control target key start
LH: loop header
LB: loop body
LE: loop exit
PB: predicated region body
PF: predicated region fallthrough
CT: control target
= control target key end

     0   :  { %9 = vsyncpa [#allocation4], 0  ;;  %s1580_s0 = inlined_call_operand.hbm [shape: bf16[16,1024], index: 0, kind: input, shape index: {}]   ;;  %s1581_s1 = inlined_call_operand.hbm [shape: bf16[16,1024], index: 1, kind: input, shape index: {}]   ;;  %s1582_s2 = inlined_call_operand.hbm [shape: bf16[1024,128], index: 2, kind: input, shape index: {}]   ;;  %s1583_s3 = inlined_call_operand.vmem [shape: f32[1,128], index: 3, kind: input, shape index: {}]   ;;  %s1584_s4 = inlined_call_operand.hbm [shape: f32[3], index: 4, kind: output, shape index: {}]  }
   0x1   :  { %10 = vsyncpa [#allocation7], 0 }
   0x2   :  { %11 = vsyncpa [#allocation5], 0  ;;  %s1460_s15 = smov [#allocation6]   ;;  %s1461_s17 = smov [#allocation3]  }
   0x3   :  { %s29_s16 = sshll.u32 %s1460_s15, 4  ;;  %s17_s18 = sshll.u32 %s1461_s17, 4  ;;  %s30_s16 = int_to_ptr.vmem [resolvable:$true] %s29_s16  ;;  %s1494_s18 = int_to_ptr.vmem [resolvable:$true] %s17_s18 }
   0x4   :  { %s1378_s21 = scalar_lea.hbm %s1581_s1, 1024 }
   0x5   :  { %p1379_p0 = scmp.ne.s32.totalorder %s1581_s1, %s1378_s21  ;;  %p1382_p1 = scmp.lt.u32.totalorder %s1378_s21, %s1581_s1 }
   0x7   :  { %p1384_p2 = pnand %p1382_p1, %p1379_p0 }
   0x9   :  { %1387 = shalt.err (!%p1384_p2)
}
   0xa   :  { %s1388_s26 = scalar_lea.vmem %s30_s16, 1024  ;;  %p1393_p4 = scmp.lt.s32.totalorder %s30_s16, %s30_s16 }
   0xb   :  { %p1389_p3 = scmp.ne.s32.totalorder %s30_s16, %s1388_s26  ;;  %p1394_p5 = scmp.lt.s32.totalorder %s1388_s26, %s1388_s26 }
   0xd   :  { %p1395_p6 = por %p1394_p5, %p1393_p4 }
   0xf   :  { %p1396_p7 = pnand %p1395_p6, %p1389_p3 }
  0x11   :  { %1399 = shalt.err (!%p1396_p7)
}
  0x12   :  { %s1462_s27 = smov 512   ;;  %s1463_s28 = smov 32  }
  0x13   :  { %35 = dma.hbm_to_vmem [thread:$0]  %s1581_s1, 1024, %s30_s16, [#allocation7], %s1462_s27, %s1462_s27, %s1463_s28  }
  0x14   :  { %s1400_s7 = scalar_lea.hbm %s1580_s0, 1024 }
  0x15   :  { %p1401_p8 = scmp.ne.s32.totalorder %s1580_s0, %s1400_s7  ;;  %p1404_p9 = scmp.lt.u32.totalorder %s1400_s7, %s1580_s0 }
  0x17   :  { %p1406_p10 = pnand %p1404_p9, %p1401_p8 }
  0x19   :  { %1409 = shalt.err (!%p1406_p10)
}
  0x1a   :  { %s1410_s12 = scalar_lea.vmem %s1494_s18, 1024  ;;  %p1415_p12 = scmp.lt.s32.totalorder %s1494_s18, %s1494_s18 }
  0x1b   :  { %p1411_p11 = scmp.ne.s32.totalorder %s1494_s18, %s1410_s12  ;;  %p1416_p13 = scmp.lt.s32.totalorder %s1410_s12, %s1410_s12 }
  0x1d   :  { %p1417_p0 = por %p1416_p13, %p1415_p12 }
  0x1f   :  { %p1418_p1 = pnand %p1417_p0, %p1411_p11 }
  0x21   :  { %1421 = shalt.err (!%p1418_p1)
}
  0x22   :  { %23 = dma.hbm_to_vmem [thread:$0]  %s1580_s0, 1024, %s1494_s18, [#allocation4], %s1462_s27, %s1462_s27, %s1463_s28  }
  0x23   :  { %s1464_s14 = smov [#allocation8]   ;;  %s1422_s19 = scalar_lea.hbm %s1582_s2, 8192 }
  0x24   :  { %s41_s15 = sshll.u32 %s1464_s14, 4  ;;  %p1423_p2 = scmp.ne.s32.totalorder %s1582_s2, %s1422_s19  ;;  %s42_s15 = int_to_ptr.vmem [resolvable:$true] %s41_s15 }
  0x25   :  { %p1426_p3 = scmp.lt.u32.totalorder %s1422_s19, %s1582_s2 }
  0x27   :  { %p1428_p4 = pnand %p1426_p3, %p1423_p2 }
  0x29   :  { %1431 = shalt.err (!%p1428_p4)
}
  0x2a   :  { %s1432_s24 = scalar_lea.vmem %s42_s15, 8192  ;;  %p1437_p6 = scmp.lt.s32.totalorder %s42_s15, %s42_s15 }
  0x2b   :  { %p1433_p5 = scmp.ne.s32.totalorder %s42_s15, %s1432_s24  ;;  %p1438_p7 = scmp.lt.s32.totalorder %s1432_s24, %s1432_s24 }
  0x2d   :  { %p1439_p8 = por %p1438_p7, %p1437_p6 }
  0x2f   :  { %p1440_p9 = pnand %p1439_p8, %p1433_p5 }
  0x31   :  { %1443 = shalt.err (!%p1440_p9)
}
  0x32   :  { %s1465_s0 = smov 64   ;;  %s1466_s18 = smov 4  }
  0x33   :  { %47 = dma.hbm_to_vmem [thread:$0]  %s1582_s2, 8192, %s42_s15, [#allocation7], %s1465_s0, %s1465_s0, %s1466_s18  }
  0x34   :  { %1454 = dma.done.wait [#allocation4], 1024  }
  0x35   :  { %1455 = vsyncadd [#allocation4], 4294966272 }
  0x36   :  { %1456 = dma.done.wait [#allocation7], 9216  }
  0x37   :  { %1457 = vsyncadd [#allocation7], 4294958080  ;;  %v1298_v0 = vld [vmem:[#allocation8 + $0x40] sm:$0xff]   ;;  %v1302_v4 = vld [vmem:[#allocation8 + $0x48] sm:$0xff]   ;;  %vm975_vm5 = vcmask 7168   ;;  %s1444_s14 = scalar_lea.hbm %s1584_s4, 16 }
  0x38   :  { %v1299_v1 = vld [vmem:[#allocation8 + $0xc0] sm:$0xff]   ;;  %1169 = vmatprep.subr.bf16.mxu0 %v1298_v0  ;;  %v1303_v5 = vld [vmem:[#allocation8 + $0xc8] sm:$0xff]   ;;  %v1306_v8 = vld [vmem:[#allocation8 + $0x50] sm:$0xff]   ;;  %p1445_p10 = scmp.ne.s32.totalorder %s1584_s4, %s1444_s14  ;;  %p1448_p11 = scmp.lt.u32.totalorder %s1444_s14, %s1584_s4 }
  0x39   :  { %v1300_v2 = vld [vmem:[#allocation8] sm:$0xff]   ;;  %1197 = vmatprep.subr.bf16.mxu1 %v1299_v1  ;;  %v1304_v6 = vld [vmem:[#allocation8 + $0x8] sm:$0xff]   ;;  %v1307_v9 = vld [vmem:[#allocation8 + $0xd0] sm:$0xff]  }
  0x3a   :  { %v1301_v3 = vld [vmem:[#allocation8 + $0x80] sm:$0xff]   ;;  %1170 = vmatpush3.bf16.msra.mxu0 %v1300_v2  ;;  %v1305_v7 = vld [vmem:[#allocation8 + $0x88] sm:$0xff]   ;;  %v1308_v10 = vld [vmem:[#allocation8 + $0x10] sm:$0xff]   ;;  %p1450_p12 = pnand %p1448_p11, %p1445_p10 }
  0x3b   :  { %1198 = vmatpush3.bf16.msra.mxu1 %v1301_v3  ;;  %1171 = vmatprep.subr.bf16.mxu0 %v1302_v4  ;;  %v1309_v11 = vld [vmem:[#allocation8 + $0x90] sm:$0xff]   ;;  %v1310_v12 = vld [vmem:[#allocation8 + $0x58] sm:$0xff]   ;;  %v1314_v16 = vld [vmem:[#allocation8 + $0x60] sm:$0xff]  }
  0x3c   :  { %1199 = vmatprep.subr.bf16.mxu1 %v1303_v5  ;;  %v1311_v13 = vld [vmem:[#allocation8 + $0xd8] sm:$0xff]   ;;  %v1315_v17 = vld [vmem:[#allocation8 + $0xe0] sm:$0xff]   ;;  %v1318_v20 = vld [vmem:[#allocation8 + $0x68] sm:$0xff]  }
  0x3d   :  { %v1312_v14 = vld [vmem:[#allocation8 + $0x18] sm:$0xff]   ;;  %v1316_v18 = vld [vmem:[#allocation8 + $0x20] sm:$0xff]   ;;  %v1319_v21 = vld [vmem:[#allocation8 + $0xe8] sm:$0xff]  }
  0x3e   :  { %1172 = vmatpush3.bf16.msra.mxu0 %v1304_v6  ;;  %v1313_v15 = vld [vmem:[#allocation8 + $0x98] sm:$0xff]   ;;  %v1317_v19 = vld [vmem:[#allocation8 + $0xa0] sm:$0xff]   ;;  %v1320_v22 = vld [vmem:[#allocation8 + $0x28] sm:$0xff]  }
  0x3f   :  { %1200 = vmatpush3.bf16.msra.mxu1 %v1305_v7  ;;  %1173 = vmatprep.subr.bf16.mxu0 %v1306_v8  ;;  %v1321_v23 = vld [vmem:[#allocation8 + $0xa8] sm:$0xff]   ;;  %v1322_v24 = vld [vmem:[#allocation8 + $0x70] sm:$0xff]   ;;  %v1326_v28 = vld [vmem:[#allocation8 + $0x78] sm:$0xff]  }
  0x40   :  { %1201 = vmatprep.subr.bf16.mxu1 %v1307_v9  ;;  %v1323_v25 = vld [vmem:[#allocation8 + $0xf0] sm:$0xff]   ;;  %v1327_v29 = vld [vmem:[#allocation8 + $0xf8] sm:$0xff]   ;;  %v72_v32 = vld [vmem:[#allocation3] sm:$0xff] }
  0x41   :  { %v1324_v26 = vld [vmem:[#allocation8 + $0x30] sm:$0xff]   ;;  %v1328_v30 = vld [vmem:[#allocation8 + $0x38] sm:$0xff]   ;;  %v76_v33 = vld [vmem:[#allocation3 + $0x20] sm:$0xff] }
  0x42   :  { %1174 = vmatpush3.bf16.msra.mxu0 %v1308_v10  ;;  %v1325_v27 = vld [vmem:[#allocation8 + $0xb0] sm:$0xff]   ;;  %v1329_v31 = vld [vmem:[#allocation8 + $0xb8] sm:$0xff]   ;;  %v73_v34 = vld [vmem:[#allocation3 + $0x8] sm:$0xff]  ;;  %v1081_v35 = vcombine.low %v72_v32, %v76_v33  ;;  %v1082_v36 = vcombine.high %v72_v32, %v76_v33 }
  0x43   :  { %1202 = vmatpush3.bf16.msra.mxu1 %v1309_v11  ;;  %1175 = vmatprep.subr.bf16.mxu0 %v1310_v12  ;;  %v77_v37 = vld [vmem:[#allocation3 + $0x28] sm:$0xff]  ;;  %v1330_v40 = vld [vmem:[#allocation8 + $0x140] sm:$0xff]   ;;  %v1338_v48 = vld [vmem:[#allocation8 + $0x150] sm:$0xff]  }
  0x44   :  { %1203 = vmatprep.subr.bf16.mxu1 %v1311_v13  ;;  %v1083_v38 = vcombine.low %v73_v34, %v77_v37  ;;  %v1084_v39 = vcombine.high %v73_v34, %v77_v37  ;;  %719 = vmatprep.mubr.bf16.mxu0 %v1082_v36  ;;  %v1331_v41 = vld [vmem:[#allocation8 + $0x1c0] sm:$0xff]   ;;  %v1334_v44 = vld [vmem:[#allocation8 + $0x148] sm:$0xff]   ;;  %v1339_v49 = vld [vmem:[#allocation8 + $0x1d0] sm:$0xff]  }
  0x45   :  { %v1332_v42 = vld [vmem:[#allocation8 + $0x100] sm:$0xff]   ;;  %v1335_v45 = vld [vmem:[#allocation8 + $0x1c8] sm:$0xff]   ;;  %v1340_v50 = vld [vmem:[#allocation8 + $0x110] sm:$0xff]  }
  0x46   :  { %1176 = vmatpush3.bf16.msra.mxu0 %v1312_v14  ;;  %768 = vmatprep.mubr.bf16.mxu1 %v1084_v39  ;;  %v1333_v43 = vld [vmem:[#allocation8 + $0x180] sm:$0xff]   ;;  %v1336_v46 = vld [vmem:[#allocation8 + $0x108] sm:$0xff]   ;;  %v1341_v51 = vld [vmem:[#allocation8 + $0x190] sm:$0xff]  }
  0x47   :  { %1204 = vmatpush3.bf16.msra.mxu1 %v1313_v15  ;;  %1177 = vmatprep.subr.bf16.mxu0 %v1314_v16  ;;  %v1337_v47 = vld [vmem:[#allocation8 + $0x188] sm:$0xff]   ;;  %v1342_v52 = vld [vmem:[#allocation8 + $0x158] sm:$0xff]   ;;  %v1346_v56 = vld [vmem:[#allocation8 + $0x160] sm:$0xff]  }
  0x48   :  { %1205 = vmatprep.subr.bf16.mxu1 %v1315_v17  ;;  %v1343_v53 = vld [vmem:[#allocation8 + $0x1d8] sm:$0xff]   ;;  %v1347_v57 = vld [vmem:[#allocation8 + $0x1e0] sm:$0xff]   ;;  %v1350_v63 = vld [vmem:[#allocation8 + $0x168] sm:$0xff]  }
  0x49   :  { %v1344_v54 = vld [vmem:[#allocation8 + $0x118] sm:$0xff]   ;;  %v1348_v58 = vld [vmem:[#allocation8 + $0x120] sm:$0xff]   ;;  %v1351_v1 = vld [vmem:[#allocation8 + $0x1e8] sm:$0xff]  }
  0x4a   :  { %1178 = vmatpush3.bf16.msra.mxu0 %v1316_v18  ;;  %v1345_v55 = vld [vmem:[#allocation8 + $0x198] sm:$0xff]   ;;  %v1349_v59 = vld [vmem:[#allocation8 + $0x1a0] sm:$0xff]   ;;  %v1352_v2 = vld [vmem:[#allocation8 + $0x128] sm:$0xff]  }
  0x4b   :  { %1206 = vmatpush3.bf16.msra.mxu1 %v1317_v19  ;;  %1179 = vmatprep.subr.bf16.mxu0 %v1318_v20  ;;  %v80_v60 = vld [vmem:[#allocation6] sm:$0xff]  ;;  %v1353_v3 = vld [vmem:[#allocation8 + $0x1a8] sm:$0xff]   ;;  %v1354_v8 = vld [vmem:[#allocation8 + $0x170] sm:$0xff]  }
  0x4c   :  { %1207 = vmatprep.subr.bf16.mxu1 %v1319_v21  ;;  %v84_v61 = vld [vmem:[#allocation6 + $0x20] sm:$0xff]  ;;  %v81_v4 = vld [vmem:[#allocation6 + $0x8] sm:$0xff]  ;;  %v1355_v9 = vld [vmem:[#allocation8 + $0x1f0] sm:$0xff]  }
  0x4d   :  { %v1090_v62 = vcombine.high %v80_v60, %v84_v61  ;;  %v1089_v0 = vcombine.low %v80_v60, %v84_v61  ;;  %v85_v5 = vld [vmem:[#allocation6 + $0x28] sm:$0xff]  ;;  %v1356_v10 = vld [vmem:[#allocation8 + $0x130] sm:$0xff]   ;;  %v1358_v12 = vld [vmem:[#allocation8 + $0x178] sm:$0xff]  }
  0x4e   :  { %1180 = vmatpush3.bf16.msra.mxu0 %v1320_v22  ;;  %v1092_v6 = vcombine.high %v81_v4, %v85_v5  ;;  %v1091_v7 = vcombine.low %v81_v4, %v85_v5  ;;  %v1357_v11 = vld [vmem:[#allocation8 + $0x1b0] sm:$0xff]   ;;  %v1359_v13 = vld [vmem:[#allocation8 + $0x1f8] sm:$0xff]   ;;  %v1097_v34 = vld [vmem:[%s1583_s3] ss:$0 sm:$0xff] }
  0x4f   :  { %1208 = vmatpush3.bf16.msra.mxu1 %v1321_v23  ;;  %1181 = vmatprep.subr.bf16.mxu0 %v1322_v24  ;;  %v1360_v14 = vld [vmem:[#allocation8 + $0x138] sm:$0xff]   ;;  %v74_v16 = vld [vmem:[#allocation3 + $0x10] sm:$0xff] }
  0x50   :  { %1209 = vmatprep.subr.bf16.mxu1 %v1323_v25  ;;  %v1361_v15 = vld [vmem:[#allocation8 + $0x1b8] sm:$0xff]   ;;  %v78_v17 = vld [vmem:[#allocation3 + $0x30] sm:$0xff] }
  0x51   :  { %v75_v18 = vld [vmem:[#allocation3 + $0x18] sm:$0xff]  ;;  %v1085_v20 = vcombine.low %v74_v16, %v78_v17  ;;  %v1086_v21 = vcombine.high %v74_v16, %v78_v17  ;;  %v82_v24 = vld [vmem:[#allocation6 + $0x10] sm:$0xff] }
  0x52   :  { %1182 = vmatpush3.bf16.msra.mxu0 %v1324_v26  ;;  %v79_v19 = vld [vmem:[#allocation3 + $0x38] sm:$0xff]  ;;  %v86_v25 = vld [vmem:[#allocation6 + $0x30] sm:$0xff] }
  0x53   :  { %1210 = vmatpush3.bf16.msra.mxu1 %v1325_v27  ;;  %1183 = vmatprep.subr.bf16.mxu0 %v1326_v28  ;;  %v1087_v22 = vcombine.low %v75_v18, %v79_v19  ;;  %v1088_v23 = vcombine.high %v75_v18, %v79_v19  ;;  %v83_v26 = vld [vmem:[#allocation6 + $0x18] sm:$0xff]  ;;  %v1094_v27 = vcombine.high %v82_v24, %v86_v25 }
  0x54   :  { %1211 = vmatprep.subr.bf16.mxu1 %v1327_v29  ;;  %v87_v28 = vld [vmem:[#allocation6 + $0x38] sm:$0xff] }
  0x55   :  { %v1096_v29 = vcombine.high %v83_v26, %v87_v28 }
  0x56   :  { %1184 = vmatpush3.bf16.msra.mxu0 %v1328_v30  ;;  %v1093_v30 = vcombine.low %v82_v24, %v86_v25 }
  0x57   :  { %1212 = vmatpush3.bf16.msra.mxu1 %v1329_v31  ;;  %1225 = vmatprep.subr.bf16.mxu0 %v1330_v40  ;;  %v1095_v31 = vcombine.low %v83_v26, %v87_v28 }
  0x58   :  { %1253 = vmatprep.subr.bf16.mxu1 %v1331_v41 }
  0x59   :  { %720 = vmatmul.mubr.bf16.vlgmr.msra.gmra.mrb[0].mxu0 %v1081_v35 }
  0x5a   :  { %769 = vmatmul.mubr.bf16.vlgmr.msra.gmra.mrb[0].mxu1 %v1083_v38  ;;  %1226 = vmatpush3.bf16.msra.mxu0 %v1332_v42 }
  0x5b   :  { %1254 = vmatpush3.bf16.msra.mxu1 %v1333_v43  ;;  %1227 = vmatprep.subr.bf16.mxu0 %v1334_v44 }
  0x5c   :  { %1255 = vmatprep.subr.bf16.mxu1 %v1335_v45  ;;  %727 = vmatprep.mubr.bf16.mxu0 %v1090_v62 }
  0x5d   :  { %776 = vmatprep.mubr.bf16.mxu1 %v1092_v6 }
  0x5e   :  { %1228 = vmatpush3.bf16.msra.mxu0 %v1336_v46 }
  0x5f   :  { %1256 = vmatpush3.bf16.msra.mxu1 %v1337_v47  ;;  %1229 = vmatprep.subr.bf16.mxu0 %v1338_v48 }
  0x60   :  { %1257 = vmatprep.subr.bf16.mxu1 %v1339_v49 }
  0x61   :  { %728 = vmatmul.mubr.bf16.gmra.mrb[4].mxu0 %v1089_v0 }
  0x62   :  { %1230 = vmatpush3.bf16.msra.mxu0 %v1340_v50  ;;  %777 = vmatmul.mubr.bf16.gmra.mrb[4].mxu1 %v1091_v7 }
  0x63   :  { %1258 = vmatpush3.bf16.msra.mxu1 %v1341_v51  ;;  %1231 = vmatprep.subr.bf16.mxu0 %v1342_v52 }
  0x64   :  { %1259 = vmatprep.subr.bf16.mxu1 %v1343_v53  ;;  %817 = vmatprep.mubr.bf16.mxu0 %v1086_v21 }
  0x65   :  { %866 = vmatprep.mubr.bf16.mxu1 %v1088_v23 }
  0x66   :  { %1232 = vmatpush3.bf16.msra.mxu0 %v1344_v54 }
  0x67   :  { %1260 = vmatpush3.bf16.msra.mxu1 %v1345_v55  ;;  %1233 = vmatprep.subr.bf16.mxu0 %v1346_v56 }
  0x68   :  { %1261 = vmatprep.subr.bf16.mxu1 %v1347_v57 }
  0x6a   :  { %1234 = vmatpush3.bf16.msra.mxu0 %v1348_v58 }
  0x6b   :  { %1262 = vmatpush3.bf16.msra.mxu1 %v1349_v59  ;;  %1235 = vmatprep.subr.bf16.mxu0 %v1350_v63 }
  0x6c   :  { %1263 = vmatprep.subr.bf16.mxu1 %v1351_v1 }
  0x6e   :  { %1236 = vmatpush3.bf16.msra.mxu0 %v1352_v2 }
  0x6f   :  { %1264 = vmatpush3.bf16.msra.mxu1 %v1353_v3  ;;  %1237 = vmatprep.subr.bf16.mxu0 %v1354_v8 }
  0x70   :  { %1265 = vmatprep.subr.bf16.mxu1 %v1355_v9 }
  0x72   :  { %1238 = vmatpush3.bf16.msra.mxu0 %v1356_v10 }
  0x73   :  { %1266 = vmatpush3.bf16.msra.mxu1 %v1357_v11  ;;  %1239 = vmatprep.subr.bf16.mxu0 %v1358_v12 }
  0x74   :  { %1267 = vmatprep.subr.bf16.mxu1 %v1359_v13 }
  0x76   :  { %1240 = vmatpush3.bf16.msra.mxu0 %v1360_v14 }
  0x77   :  { %1268 = vmatpush3.bf16.msra.mxu1 %v1361_v15 }
  0x79   :  { %818 = vmatmul.mubr.bf16.vlgmr.msra.gmra.mrb[8].mxu0 %v1085_v20 }
  0x7a   :  { %867 = vmatmul.mubr.bf16.vlgmr.msra.gmra.mrb[8].mxu1 %v1087_v22  ;;  %825 = vmatprep.mubr.bf16.mxu0 %v1094_v27 }
  0x7b   :  { %874 = vmatprep.mubr.bf16.mxu1 %v1096_v29 }
  0x81   :  { %826 = vmatmul.mubr.bf16.gmra.mrb[12].mxu0 %v1093_v30 }
  0x82   :  { %875 = vmatmul.mubr.bf16.gmra.mrb[12].mxu1 %v1095_v31 }
 0x12c   :  { %v1185_v32 = vpop.f32.mrb[0].mxu0 }
 0x12d   :  { %v1213_v33 = vpop.f32.mrb[0].mxu1  ;;  %v1186_v35 = vpop.f32.mrb[1].mxu0 }
 0x12e   :  { %v1187_v36 = vadd.f32 %v1186_v35, %v1185_v32  ;;  %v1214_v37 = vpop.f32.mrb[1].mxu1  ;;  %v1188_v38 = vpop.f32.mrb[2].mxu0 }
 0x12f   :  { %v1215_v39 = vadd.f32 %v1214_v37, %v1213_v33  ;;  %v1216_v40 = vpop.f32.mrb[2].mxu1  ;;  %v1189_v41 = vpop.f32.mrb[3].mxu0 }
 0x130   :  { %v722_v42 = vadd.f32 %v1187_v36, %v1097_v34  ;;  %v1190_v43 = vadd.f32 %v1189_v41, %v1188_v38  ;;  %v1217_v44 = vpop.f32.mrb[3].mxu1 }
 0x131   :  { %v1218_v45 = vadd.f32 %v1217_v44, %v1216_v40 }
 0x132   :  { %v771_v46 = vadd.f32 %v1215_v39, %v722_v42  ;;  %v725_v47 = vadd.f32 %v1190_v43, %v1097_v34 }
 0x134   :  { %v774_v48 = vadd.f32 %v1218_v45, %v725_v47  ;;  %v1191_v49 = vpop.f32.mrb[4].mxu0 }
 0x135   :  { %v1192_v50 = vpop.f32.mrb[5].mxu0  ;;  %v1219_v56 = vpop.f32.mrb[4].mxu1 }
 0x136   :  { %v1193_v51 = vadd.f32 %v1192_v50, %v1191_v49  ;;  %v1194_v52 = vpop.f32.mrb[6].mxu0  ;;  %v1220_v57 = vpop.f32.mrb[5].mxu1 }
 0x137   :  { %v1195_v53 = vpop.f32.mrb[7].mxu0  ;;  %v1221_v59 = vadd.f32 %v1220_v57, %v1219_v56  ;;  %v1222_v60 = vpop.f32.mrb[6].mxu1 }
 0x138   :  { %v1196_v54 = vadd.f32 %v1195_v53, %v1194_v52  ;;  %v730_v55 = vadd.f32 %v1193_v51, %v1097_v34  ;;  %v1223_v61 = vpop.f32.mrb[7].mxu1 }
 0x139   :  { %v1224_v63 = vadd.f32 %v1223_v61, %v1222_v60 }
 0x13a   :  { %v733_v58 = vadd.f32 %v1196_v54, %v1097_v34  ;;  %v779_v62 = vadd.f32 %v1221_v59, %v730_v55 }
 0x13c   :  { %v782_v0 = vadd.f32 %v1224_v63, %v733_v58 }
 0x14c   :  { %v1241_v1 = vpop.f32.mrb[8].mxu0 }
 0x14d   :  { %v1269_v2 = vpop.f32.mrb[8].mxu1  ;;  %v1242_v3 = vpop.f32.mrb[9].mxu0 }
 0x14e   :  { %v1270_v4 = vpop.f32.mrb[9].mxu1  ;;  %v1243_v5 = vadd.f32 %v1242_v3, %v1241_v1  ;;  %v1244_v7 = vpop.f32.mrb[10].mxu0 }
 0x14f   :  { %v1271_v6 = vadd.f32 %v1270_v4, %v1269_v2  ;;  %v1272_v8 = vpop.f32.mrb[10].mxu1  ;;  %v1245_v9 = vpop.f32.mrb[11].mxu0 }
 0x150   :  { %v1273_v10 = vpop.f32.mrb[11].mxu1  ;;  %v820_v11 = vadd.f32 %v1243_v5, %v771_v46  ;;  %v1246_v12 = vadd.f32 %v1245_v9, %v1244_v7 }
 0x151   :  { %v1274_v13 = vadd.f32 %v1273_v10, %v1272_v8 }
 0x152   :  { %v1540_v14 = vadd.f32 %v1271_v6, %v820_v11  ;;  %v823_v15 = vadd.f32 %v1246_v12, %v774_v48 }
 0x154   :  { %v887_v16 = vand.u32 2147483647, %v1540_v14  ;;  %v1543_v17 = vadd.f32 %v1274_v13, %v823_v15  ;;  %v1247_v18 = vpop.f32.mrb[12].mxu0  ;;  %951 = vadd.xlane.f32.xlu0 %v1540_v14 }
 0x155   :  { %v1275_v19 = vpop.f32.mrb[12].mxu1  ;;  %v1248_v20 = vpop.f32.mrb[13].mxu0 }
 0x156   :  { %v1276_v21 = vpop.f32.mrb[13].mxu1  ;;  %v891_v22 = vsub.f32 0.0, %v887_v16  ;;  %v888_v23 = vand.u32 2147483647, %v1543_v17  ;;  %v1249_v24 = vadd.f32 %v1248_v20, %v1247_v18  ;;  %v1250_v26 = vpop.f32.mrb[14].mxu0  ;;  %953 = vadd.xlane.f32.xlu1 %v1543_v17  ;;  %v884_v8 = vmax.f32 %v1543_v17, 0.0 }
 0x157   :  { %v1277_v25 = vadd.f32 %v1276_v21, %v1275_v19  ;;  %v1278_v27 = vpop.f32.mrb[14].mxu1  ;;  %v1251_v28 = vpop.f32.mrb[15].mxu0 }
 0x158   :  { %v1279_v29 = vpop.f32.mrb[15].mxu1  ;;  %v895_v30 = vmul.f32 1.442695, %v891_v22  ;;  %v892_v31 = vsub.f32 0.0, %v888_v23  ;;  %v828_v32 = vadd.f32 %v1249_v24, %v779_v62  ;;  %v1252_v33 = vadd.f32 %v1251_v28, %v1250_v26 }
 0x159   :  { %v1280_v34 = vadd.f32 %v1279_v29, %v1278_v27  ;;  %v1467_v27 = vmov 0.0  }
 0x15a   :  { %1362 = vpow2.f32 %v895_v30  ;;  %v897_v35 = vmul.f32 1.442695, %v892_v31  ;;  %v1548_v36 = vadd.f32 %v1277_v25, %v828_v32  ;;  %v831_v37 = vadd.f32 %v1252_v33, %v782_v0 }
 0x15b   :  { %v883_v0 = vmax.f32 %v1540_v14, 0.0  ;;  %v959_v25 = vlaneseq }
 0x15c   :  { %1364 = vpow2.f32 %v897_v35  ;;  %v889_v38 = vand.u32 2147483647, %v1548_v36  ;;  %v1551_v39 = vadd.f32 %v1280_v34, %v831_v37  ;;  %v885_v18 = vmax.f32 %v1548_v36, 0.0 }
 0x15d   :  { %v960_v26 = vshrl.u32 %v959_v25, 7 }
 0x15e   :  { %v893_v40 = vsub.f32 0.0, %v889_v38  ;;  %v890_v41 = vand.u32 2147483647, %v1551_v39  ;;  %v886_v17 = vmax.f32 %v1551_v39, 0.0 }
 0x15f   :  { %vm966_vm4 = vcmp.lt.s32.totalorder %v960_v26, 2 }
 0x160   :  { %v899_v42 = vmul.f32 1.442695, %v893_v40  ;;  %v894_v43 = vsub.f32 0.0, %v890_v41  ;;  %v1162_v28 = vsel %vm966_vm4, 1.0, %v1467_v27 }
 0x162   :  { %1366 = vpow2.f32 %v899_v42  ;;  %v901_v44 = vmul.f32 1.442695, %v894_v43 }
 0x164   :  { %v1363_v45 = vpop.eup %1362  ;;  %1368 = vpow2.f32 %v901_v44 }
 0x165   :  { %v903_v46 = vadd.f32 1.0, %v1363_v45  ;;  %v906_v49 = vmul.f32 -0.5, %v1363_v45  ;;  %v909_v55 = vand.u32 2147483647, %v1363_v45 }
 0x166   :  { %v1365_v47 = vpop.eup %1364 }
 0x167   :  { %1370 = vlog2.f32 %v903_v46  ;;  %v912_v48 = vadd.f32 1.0, %v1365_v47  ;;  %v915_v51 = vmul.f32 -0.5, %v1365_v47  ;;  %v907_v54 = vadd.f32 1.0, %v906_v49 }
 0x168   :  { %v918_v59 = vand.u32 2147483647, %v1365_v47  ;;  %vm910_vm0 = vcmp.lt.f32.partialorder %v909_v55, 0.0004427343 }
 0x169   :  { %1372 = vlog2.f32 %v912_v48  ;;  %v916_v57 = vadd.f32 1.0, %v915_v51  ;;  %v908_v61 = vmul.f32 %v1363_v45, %v907_v54 }
 0x16a   :  { %vm919_vm1 = vcmp.lt.f32.partialorder %v918_v59, 0.0004427343 }
 0x16b   :  { %v917_v3 = vmul.f32 %v1365_v47, %v916_v57 }
 0x16c   :  { %v1367_v50 = vpop.eup %1366 }
 0x16d   :  { %v921_v52 = vadd.f32 1.0, %v1367_v50  ;;  %v924_v62 = vmul.f32 -0.5, %v1367_v50  ;;  %v927_v9 = vand.u32 2147483647, %v1367_v50 }
 0x16e   :  { %v1369_v53 = vpop.eup %1368 }
 0x16f   :  { %1374 = vlog2.f32 %v921_v52  ;;  %v930_v56 = vadd.f32 1.0, %v1369_v53  ;;  %v933_v4 = vmul.f32 -0.5, %v1369_v53  ;;  %v925_v7 = vadd.f32 1.0, %v924_v62 }
 0x170   :  { %v936_v13 = vand.u32 2147483647, %v1369_v53  ;;  %vm928_vm2 = vcmp.lt.f32.partialorder %v927_v9, 0.0004427343 }
 0x171   :  { %v1371_v58 = vpop.eup %1370  ;;  %1376 = vlog2.f32 %v930_v56  ;;  %v934_v10 = vadd.f32 1.0, %v933_v4  ;;  %v926_v16 = vmul.f32 %v1367_v50, %v925_v7 }
 0x172   :  { %v905_v60 = vmul.f32 0.6931472, %v1371_v58  ;;  %vm937_vm3 = vcmp.lt.f32.partialorder %v936_v13, 0.0004427343 }
 0x173   :  { %v1373_v63 = vpop.eup %1372  ;;  %v935_v21 = vmul.f32 %v1369_v53, %v934_v10 }
 0x174   :  { %v911_v1 = vsel %vm910_vm0, %v908_v61, %v905_v60  ;;  %v914_v2 = vmul.f32 0.6931472, %v1373_v63 }
 0x175   :  { %v939_v5 = vadd.f32 %v911_v1, %v883_v0 }
 0x176   :  { %v920_v6 = vsel %vm919_vm1, %v917_v3, %v914_v2 }
 0x177   :  { %943 = vadd.xlane.f32.xlu0 %v939_v5  ;;  %v940_v12 = vadd.f32 %v920_v6, %v884_v8 }
 0x179   :  { %v1375_v11 = vpop.eup %1374 }
 0x17a   :  { %v923_v15 = vmul.f32 0.6931472, %v1375_v11 }
 0x17b   :  { %v1377_v14 = vpop.eup %1376  ;;  %945 = vadd.xlane.f32.xlu0 %v940_v12 }
 0x17c   :  { %v929_v19 = vsel %vm928_vm2, %v926_v16, %v923_v15  ;;  %v932_v20 = vmul.f32 0.6931472, %v1377_v14 }
 0x17d   :  { %v941_v22 = vadd.f32 %v929_v19, %v885_v18 }
 0x17e   :  { %v938_v23 = vsel %vm937_vm3, %v935_v21, %v932_v20 }
 0x17f   :  { %947 = vadd.xlane.f32.xlu1 %v941_v22  ;;  %955 = vadd.xlane.f32.xlu0 %v1548_v36  ;;  %v942_v24 = vadd.f32 %v938_v23, %v886_v17 }
 0x183   :  { %949 = vadd.xlane.f32.xlu1 %v942_v24 }
 0x187   :  { %957 = vadd.xlane.f32.xlu1 %v1551_v39 }
 0x1e1   :  { %v952_v29 = vpop.xlane.xlu0 %951 }
 0x1e2   :  { %v992_v30 = vmul.f32 %v1162_v28, %v952_v29 }
 0x1e3   :  { %v954_v31 = vpop.xlane.xlu1 %953 }
 0x1e4   :  { %v993_v32 = vmul.f32 0.0, %v954_v31  ;;  %v994_v33 = vsel %vm975_vm5, %v992_v30, 0.0 }
 0x1e6   :  { %v995_v34 = vsel %vm975_vm5, %v993_v32, 0.0 }
 0x1e7   :  { %v996_v35 = vadd.f32 %v995_v34, %v994_v33 }
 0x1e9   :  { %997 = vadd.xlane.f32.xlu1 %v996_v35 }
 0x204   :  { %v944_v36 = vpop.xlane.xlu0 %943 }
 0x205   :  { %v973_v37 = vmul.f32 %v1162_v28, %v944_v36 }
 0x207   :  { %v976_v40 = vsel %vm975_vm5, %v973_v37, 0.0 }
 0x208   :  { %v946_v38 = vpop.xlane.xlu0 %945 }
 0x209   :  { %v974_v39 = vmul.f32 0.0, %v946_v38 }
 0x20b   :  { %v977_v41 = vsel %vm975_vm5, %v974_v39, 0.0 }
 0x20c   :  { %v948_v42 = vpop.xlane.xlu1 %947  ;;  %v978_v43 = vadd.f32 %v977_v41, %v976_v40  ;;  %v956_v45 = vpop.xlane.xlu0 %955 }
 0x20d   :  { %v1010_v44 = vmul.f32 %v1162_v28, %v948_v42  ;;  %v1028_v48 = vmul.f32 %v1162_v28, %v956_v45 }
 0x20e   :  { %979 = vadd.xlane.f32.xlu0 %v978_v43 }
 0x20f   :  { %v1012_v49 = vsel %vm975_vm5, %v1010_v44, 0.0  ;;  %v1030_v54 = vsel %vm975_vm5, %v1028_v48, 0.0 }
 0x210   :  { %v950_v46 = vpop.xlane.xlu1 %949 }
 0x211   :  { %v1011_v47 = vmul.f32 0.0, %v950_v46 }
 0x213   :  { %v1013_v50 = vsel %vm975_vm5, %v1011_v47, 0.0 }
 0x214   :  { %v958_v51 = vpop.xlane.xlu1 %957  ;;  %v1014_v52 = vadd.f32 %v1013_v50, %v1012_v49 }
 0x215   :  { %v1029_v53 = vmul.f32 0.0, %v958_v51 }
 0x216   :  { %1015 = vadd.xlane.f32.xlu0 %v1014_v52 }
 0x217   :  { %v1031_v55 = vsel %vm975_vm5, %v1029_v53, 0.0 }
 0x218   :  { %v1032_v56 = vadd.f32 %v1031_v55, %v1030_v54 }
 0x21a   :  { %1033 = vadd.xlane.f32.xlu1 %v1032_v56 }
 0x276   :  { %v998_v57 = vpop.xlane.xlu1 %997 }
 0x277   :  { %v999_v58 = vrot.slane %v998_v57, 4 }
 0x279   :  { %v1000_v59 = vadd.f32 %v999_v58, %v998_v57 }
 0x27b   :  { %v1001_v60 = vrot.slane %v1000_v59, 2 }
 0x27d   :  { %v1002_v0 = vadd.f32 %v1001_v60, %v1000_v59 }
 0x27f   :  { %v1003_v4 = vrot.slane %v1002_v0, 1 }
 0x281   :  { %v1004_v10 = vadd.f32 %v1003_v4, %v1002_v0 }
 0x29b   :  { %v980_v61 = vpop.xlane.xlu0 %979 }
 0x29c   :  { %v981_v62 = vrot.slane %v980_v61, 4 }
 0x29e   :  { %v982_v63 = vadd.f32 %v981_v62, %v980_v61 }
 0x2a0   :  { %v983_v1 = vrot.slane %v982_v63, 2 }
 0x2a2   :  { %v984_v2 = vadd.f32 %v983_v1, %v982_v63 }
 0x2a3   :  { %v1016_v3 = vpop.xlane.xlu0 %1015 }
 0x2a4   :  { %v1017_v5 = vrot.slane %v1016_v3, 4  ;;  %v985_v6 = vrot.slane %v984_v2, 1 }
 0x2a6   :  { %v1018_v7 = vadd.f32 %v1017_v5, %v1016_v3  ;;  %v986_v8 = vadd.f32 %v985_v6, %v984_v2 }
 0x2a7   :  { %v1034_v9 = vpop.xlane.xlu1 %1033 }
 0x2a8   :  { %v1019_v11 = vrot.slane %v1018_v7, 2  ;;  %v1035_v12 = vrot.slane %v1034_v9, 4  ;;  %1281 = vpush %v986_v8 }
 0x2a9   :  { %1283 = vpush %v1004_v10 }
 0x2aa   :  { %v1020_v13 = vadd.f32 %v1019_v11, %v1018_v7  ;;  %v1036_v15 = vadd.f32 %v1035_v12, %v1034_v9 }
 0x2ac   :  { %v1037_v16 = vrot.slane %v1036_v15, 2  ;;  %v1021_v14 = vrot.slane %v1020_v13, 1 }
 0x2ae   :  { %v1038_v18 = vadd.f32 %v1037_v16, %v1036_v15  ;;  %v1022_v19 = vadd.f32 %v1021_v14, %v1020_v13 }
 0x2b0   :  { %1285 = vpush %v1022_v19  ;;  %v1039_v20 = vrot.slane %v1038_v18, 1 }
 0x2b2   :  { %v1040_v21 = vadd.f32 %v1039_v20, %v1038_v18 }
 0x2b4   :  { %1287 = vpush %v1040_v21 }
 0x2d9   :  { %s1282_s3 = spop %1281 }
 0x2da   :  { %s1284_s28 = spop %1283 }
 0x2db   :  { %s1050_s29 = ssub.f32 %s1282_s3, %s1284_s28 }
 0x2dd   :  { %s1051_s30 = smul.f32 0.00390625, %s1050_s29 }
 0x2df   :  { %1059 = sst [smem:[#allocation9]] %s1051_s30 }
 0x2e1   :  { %s1286_s5 = spop %1285 }
 0x2e5   :  { %s1288_s6 = spop %1287 }
 0x2e6   :  { %s1054_s7 = smul.f32 0.9, %s1288_s6 }
 0x2e8   :  { %s1055_s8 = ssub.f32 %s1286_s5, %s1054_s7 }
 0x2ea   :  { %s1056_s9 = sadd.f32 %s1282_s3, %s1055_s8 }
 0x2ec   :  { %s1057_s10 = smul.f32 0.001953125, %s1056_s9 }
 0x2ee   :  { %s1062_s11 = sadd.f32 %s1057_s10, %s1051_s30 }
 0x2ef   :  { %1061 = sst [smem:[#allocation9 + $0x1]] %s1057_s10 }
 0x2f0   :  { %s1063_s12 = smul.f32 0.5, %s1062_s11 }
 0x2f2   :  { %1065 = sst [smem:[#allocation9 + $0x2]] %s1063_s12 }
 0x2f3   :  { %1453 = shalt.err (!%p1450_p12)
}
 0x2f4   :  { %s1468_s20 = smov [#allocation9]  }
 0x2f5   :  { %1073 = dma.smem_to_hbm %s1468_s20, 16, %s1584_s4, [#allocation5]  }
 0x2f6   :  { %1458 = dma.done.wait [#allocation5], 16  }
 0x2f7   :  { %1459 = vsyncadd [#allocation5], 4294967280 }
 0x2f8   :  { %1077 = sfence }
 0x2f9   :  { %1078 = vsyncpa [#allocation4], 1 }
 0x2fa   :  { %1079 = vsyncpa [#allocation7], 1 }
 0x2fb   :  { %1080 = vsyncpa [#allocation5], 1 }

</bundles_post_ra>
